<compile_context>
chip_gen: v5e
topology: v5e:2x2
jax: 0.10.0
libtpu: 0.0.40
codegen_flags: <defaults>
</compile_context>

<pallas_src>
import jax
import jax.numpy as jnp
from jax.experimental import pallas as pl
from jax.experimental.pallas import tpu as pltpu

LN_EPS = 1e-5


def attention_layer_kernel(x_ref, w_ref, bw_ref, vw_ref, gamma_ref, beta_ref,
                           out_ref):
    bt, S, H = x_ref.shape

    x3 = x_ref[...]                                     # (Bt, S, H) f32
    x2 = x3.reshape(bt * S, H)                          # layout-preserving merge

    # ---- u = tanh(x @ W_t + b_w): bf16 MXU matmul, f32 accumulate ----------
    u2 = jnp.tanh(
        jnp.dot(x2.astype(jnp.bfloat16), w_ref[...],
                preferred_element_type=jnp.float32)
        + bw_ref[...])                                  # (Bt*S, H) f32

    # ---- score = u @ V^T   (V bias omitted: softmax is shift-invariant) ----
    u3 = u2.reshape(bt, S, H)
    score = jnp.sum(u3 * vw_ref[...], axis=-1, keepdims=True)    # (Bt, S, 1)

    # ---- softmax over the seq axis (per batch) ------------------------------
    m = jnp.max(score, axis=1, keepdims=True)           # (Bt, 1, 1)
    e = jnp.exp(score - m)
    denom = jnp.sum(e, axis=1, keepdims=True)           # (Bt, 1, 1)
    attn = e * pl.reciprocal(denom, approx=True)        # EUP reciprocal

    # dropout: identity (eval mode)

    # ---- y = x + x * attn ; LayerNorm over hidden (f32) ---------------------
    y = x3 * (1.0 + attn)                               # (Bt, S, H)
    mean = jnp.mean(y, axis=-1, keepdims=True)
    centered = y - mean
    var = jnp.mean(centered * centered, axis=-1, keepdims=True)
    inv_std = jax.lax.rsqrt(var + LN_EPS)
    out_ref[...] = centered * inv_std * gamma_ref[...] + beta_ref[...]


def _pick_block_batch(batch, target=8):
    """Largest divisor of `batch` <= target, preferring >= 2 grid steps."""
    divisors = [d for d in range(1, min(batch, target) + 1) if batch % d == 0]
    bt = divisors[-1]
    if batch // bt < 2:
        two_step = [d for d in divisors if batch // d >= 2]
        if two_step:
            bt = two_step[-1]   # keep >= 2 grid steps (v7x has 2 TensorCores)
    return bt


def attention_layer(x, w, b_w, v_w, b_v, gamma, beta, *, block_batch=None):
    """x: (B, S, H) float32. Weights follow PyTorch layouts:
       w: (H, H) = W.weight (out,in); b_w: (H,); v_w: (1, H); b_v: (1,);
       gamma/beta: (H,)."""
    B, S, H = x.shape
    del b_v  # softmax(V(u) + b_v) == softmax(V(u)) -> dead compute/DMA

    bt = _pick_block_batch(B) if block_batch is None else block_batch
    assert B % bt == 0, "block_batch must divide batch"

    # Hoist the transpose out of the (sequential) grid loop and pre-cast the
    # MXU weight operand to bf16 (halves its DMA bytes / VMEM residency).
    w_t = jnp.asarray(w).T.astype(jnp.bfloat16)         # (H_in, H_out)
    bw2 = b_w.reshape(1, H).astype(jnp.float32)
    vw2 = v_w.reshape(1, H).astype(jnp.float32)
    gamma2 = gamma.reshape(1, H).astype(jnp.float32)
    beta2 = beta.reshape(1, H).astype(jnp.float32)

    return pl.pallas_call(
        attention_layer_kernel,
        out_shape=jax.ShapeDtypeStruct((B, S, H), jnp.float32),
        grid_spec=pltpu.PrefetchScalarGridSpec(
            num_scalar_prefetch=0,
            grid=(B // bt,),
            in_specs=[
                pl.BlockSpec((bt, S, H), lambda b: (b, 0, 0)),   # x
                # Grid-invariant operands (constant index_map -> fetched once):
                pl.BlockSpec((H, H), lambda b: (0, 0)),          # W^T (bf16)
                pl.BlockSpec((1, H), lambda b: (0, 0)),          # W bias
                pl.BlockSpec((1, H), lambda b: (0, 0)),          # V weight
                pl.BlockSpec((1, H), lambda b: (0, 0)),          # LN gamma
                pl.BlockSpec((1, H), lambda b: (0, 0)),          # LN beta
            ],
            out_specs=pl.BlockSpec((bt, S, H), lambda b: (b, 0, 0)),
        ),
        compiler_params=pltpu.CompilerParams(
            dimension_semantics=("parallel",),       # batch-block axis -> both TCs
            vmem_limit_bytes=32 * 1024 * 1024,       # headroom for larger S/H
        ),
    )(x.astype(jnp.float32), w_t, bw2, vw2, gamma2, beta2)


def attention_layer_ref(x, w, b_w, v_w, b_v, gamma, beta):
    """Pure-JAX f32 reference mirroring the PyTorch forward (eval mode)."""
    u = jnp.tanh(jnp.einsum("bsh,oh->bso", x, w) + b_w)
    score = jnp.einsum("bsh,oh->bso", u, v_w) + b_v          # (B, S, 1)
    attn = jax.nn.softmax(score, axis=1)
    y = x + x * attn
    mean = jnp.mean(y, axis=-1, keepdims=True)
    var = jnp.mean((y - mean) ** 2, axis=-1, keepdims=True)
    return (y - mean) / jnp.sqrt(var + LN_EPS) * gamma + beta


if __name__ == "__main__":
    B, S, H = 4, 8, 32   # B=4 -> Bt=2 per step, 2 grid steps

    key = jax.random.PRNGKey(0)
    kx, kw, kbw, kvw, kbv = jax.random.split(key, 5)

    x = jax.random.normal(kx, (B, S, H), dtype=jnp.float32)

    bound = 1.0 / (H ** 0.5)
    w = jax.random.uniform(kw, (H, H), jnp.float32, -bound, bound)
    b_w = jax.random.uniform(kbw, (H,), jnp.float32, -bound, bound)
    v_w = jax.random.uniform(kvw, (1, H), jnp.float32, -bound, bound)
    b_v = jax.random.uniform(kbv, (1,), jnp.float32, -bound, bound)
    gamma = jnp.ones((H,), jnp.float32)
    beta = jnp.zeros((H,), jnp.float32)

    out = jax.block_until_ready(
        attention_layer(x, w, b_w, v_w, b_v, gamma, beta))
    ref = attention_layer_ref(x, w, b_w, v_w, b_v, gamma, beta)

    assert out.shape == (B, S, H)
    max_err = float(jnp.max(jnp.abs(out - ref)))
    # Tolerance accounts for the bf16 MXU matmul (f32 accumulation) and the
    # approx EUP reciprocal in the softmax denominator.
    assert jnp.allclose(out, ref, atol=2e-2, rtol=2e-2), max_err

    print("KERNEL_OK")
</pallas_src>

<mosaic_0001>
module attributes {stable_mosaic.version = 11 : i64} {
  func.func @attention_layer_kernel(%arg0: i32, %arg1: memref<2x8x32xf32, #tpu.memory_space<vmem>>, %arg2: memref<32x32xbf16, #tpu.memory_space<vmem>>, %arg3: memref<1x32xf32, #tpu.memory_space<vmem>>, %arg4: memref<1x32xf32, #tpu.memory_space<vmem>>, %arg5: memref<1x32xf32, #tpu.memory_space<vmem>>, %arg6: memref<1x32xf32, #tpu.memory_space<vmem>>, %arg7: memref<2x8x32xf32, #tpu.memory_space<vmem>>) attributes {dimension_semantics = [#tpu.dimension_semantics<parallel>], iteration_bounds = array<i64: 2>, scalar_prefetch = 0 : i64, scratch_operands = 0 : i64, tpu.core_type = #tpu.core_type<tc>, window_params = [{transform_indices = @transform_0, window_bounds = array<i64: 2, 8, 32>}, {pipeline_mode = #tpu.pipeline_mode<synchronous>, transform_indices = @transform_1, window_bounds = array<i64: 32, 32>}, {pipeline_mode = #tpu.pipeline_mode<synchronous>, transform_indices = @transform_2, window_bounds = array<i64: 1, 32>}, {pipeline_mode = #tpu.pipeline_mode<synchronous>, transform_indices = @transform_3, window_bounds = array<i64: 1, 32>}, {pipeline_mode = #tpu.pipeline_mode<synchronous>, transform_indices = @transform_4, window_bounds = array<i64: 1, 32>}, {pipeline_mode = #tpu.pipeline_mode<synchronous>, transform_indices = @transform_5, window_bounds = array<i64: 1, 32>}, {transform_indices = @transform_6, window_bounds = array<i64: 2, 8, 32>}]} {
    %c0 = arith.constant 0 : index
    %c0_0 = arith.constant 0 : index
    %c0_1 = arith.constant 0 : index
    %0 = vector.load %arg1[%c0, %c0_0, %c0_1] : memref<2x8x32xf32, #tpu.memory_space<vmem>>, vector<2x8x32xf32>
    %1 = vector.shape_cast %0 : vector<2x8x32xf32> to vector<16x32xf32>
    %2 = arith.truncf %1 : vector<16x32xf32> to vector<16x32xbf16>
    %c0_2 = arith.constant 0 : index
    %c0_3 = arith.constant 0 : index
    %3 = vector.load %arg2[%c0_2, %c0_3] : memref<32x32xbf16, #tpu.memory_space<vmem>>, vector<32x32xbf16>
    %cst = arith.constant dense<0.000000e+00> : vector<16x32xf32>
    %4 = tpu.matmul %2, %3, %cst {dimension_numbers = #tpu.dot_dimension_numbers<[1], [0], [0], [1], [0, 0, 1, 1], [], []>} : vector<16x32xbf16>, vector<32x32xbf16>, vector<16x32xf32> -> vector<16x32xf32>
    %c0_4 = arith.constant 0 : index
    %c0_5 = arith.constant 0 : index
    %5 = vector.load %arg3[%c0_4, %c0_5] : memref<1x32xf32, #tpu.memory_space<vmem>>, vector<1x32xf32>
    %6 = vector.broadcast %5 : vector<1x32xf32> to vector<16x32xf32>
    %7 = arith.addf %4, %6 : vector<16x32xf32>
    %8 = math.tanh %7 : vector<16x32xf32>
    %9 = vector.shape_cast %8 : vector<16x32xf32> to vector<2x8x32xf32>
    %c0_6 = arith.constant 0 : index
    %c0_7 = arith.constant 0 : index
    %10 = vector.load %arg4[%c0_6, %c0_7] : memref<1x32xf32, #tpu.memory_space<vmem>>, vector<1x32xf32>
    %11 = vector.shape_cast %10 : vector<1x32xf32> to vector<1x1x32xf32>
    %12 = vector.broadcast %11 : vector<1x1x32xf32> to vector<2x8x32xf32>
    %13 = arith.mulf %9, %12 : vector<2x8x32xf32>
    %cst_8 = arith.constant dense<0.000000e+00> : vector<2x8xf32>
    %14 = vector.multi_reduction <add>, %13, %cst_8 [2] : vector<2x8x32xf32> to vector<2x8xf32>
    %15 = vector.shape_cast %14 : vector<2x8xf32> to vector<2x8x1xf32>
    %cst_9 = arith.constant dense<0xFF800000> : vector<2x1xf32>
    %16 = vector.multi_reduction <maximumf>, %15, %cst_9 [1] : vector<2x8x1xf32> to vector<2x1xf32>
    %17 = vector.shape_cast %16 : vector<2x1xf32> to vector<2x1x1xf32>
    %18 = vector.broadcast %17 : vector<2x1x1xf32> to vector<2x8x1xf32>
    %19 = arith.subf %15, %18 : vector<2x8x1xf32>
    %20 = math.exp %19 : vector<2x8x1xf32>
    %cst_10 = arith.constant dense<0.000000e+00> : vector<2x1xf32>
    %21 = vector.multi_reduction <add>, %20, %cst_10 [1] : vector<2x8x1xf32> to vector<2x1xf32>
    %22 = vector.shape_cast %21 : vector<2x1xf32> to vector<2x1x1xf32>
    %23 = tpu.reciprocal %22 {approx = true} : vector<2x1x1xf32> -> vector<2x1x1xf32>
    %24 = vector.broadcast %23 : vector<2x1x1xf32> to vector<2x8x1xf32>
    %25 = arith.mulf %20, %24 : vector<2x8x1xf32>
    %cst_11 = arith.constant 1.000000e+00 : f32
    %26 = vector.broadcast %cst_11 : f32 to vector<2x8x1xf32>
    %27 = arith.addf %26, %25 : vector<2x8x1xf32>
    %28 = vector.broadcast %27 : vector<2x8x1xf32> to vector<2x8x32xf32>
    %29 = arith.mulf %0, %28 : vector<2x8x32xf32>
    %cst_12 = arith.constant dense<0.000000e+00> : vector<2x8xf32>
    %30 = vector.multi_reduction <add>, %29, %cst_12 [2] : vector<2x8x32xf32> to vector<2x8xf32>
    %31 = vector.shape_cast %30 : vector<2x8xf32> to vector<2x8x1xf32>
    %cst_13 = arith.constant 3.200000e+01 : f32
    %32 = vector.broadcast %cst_13 : f32 to vector<2x8x1xf32>
    %33 = arith.divf %31, %32 : vector<2x8x1xf32>
    %34 = vector.broadcast %33 : vector<2x8x1xf32> to vector<2x8x32xf32>
    %35 = arith.subf %29, %34 : vector<2x8x32xf32>
    %36 = arith.mulf %35, %35 : vector<2x8x32xf32>
    %cst_14 = arith.constant dense<0.000000e+00> : vector<2x8xf32>
    %37 = vector.multi_reduction <add>, %36, %cst_14 [2] : vector<2x8x32xf32> to vector<2x8xf32>
    %38 = vector.shape_cast %37 : vector<2x8xf32> to vector<2x8x1xf32>
    %cst_15 = arith.constant 3.200000e+01 : f32
    %39 = vector.broadcast %cst_15 : f32 to vector<2x8x1xf32>
    %40 = arith.divf %38, %39 : vector<2x8x1xf32>
    %cst_16 = arith.constant 9.99999974E-6 : f32
    %41 = vector.broadcast %cst_16 : f32 to vector<2x8x1xf32>
    %42 = arith.addf %40, %41 : vector<2x8x1xf32>
    %43 = math.rsqrt %42 : vector<2x8x1xf32>
    %44 = vector.broadcast %43 : vector<2x8x1xf32> to vector<2x8x32xf32>
    %45 = arith.mulf %35, %44 : vector<2x8x32xf32>
    %c0_17 = arith.constant 0 : index
    %c0_18 = arith.constant 0 : index
    %46 = vector.load %arg5[%c0_17, %c0_18] : memref<1x32xf32, #tpu.memory_space<vmem>>, vector<1x32xf32>
    %47 = vector.shape_cast %46 : vector<1x32xf32> to vector<1x1x32xf32>
    %48 = vector.broadcast %47 : vector<1x1x32xf32> to vector<2x8x32xf32>
    %49 = arith.mulf %45, %48 : vector<2x8x32xf32>
    %c0_19 = arith.constant 0 : index
    %c0_20 = arith.constant 0 : index
    %50 = vector.load %arg6[%c0_19, %c0_20] : memref<1x32xf32, #tpu.memory_space<vmem>>, vector<1x32xf32>
    %51 = vector.shape_cast %50 : vector<1x32xf32> to vector<1x1x32xf32>
    %52 = vector.broadcast %51 : vector<1x1x32xf32> to vector<2x8x32xf32>
    %53 = arith.addf %49, %52 : vector<2x8x32xf32>
    %c0_21 = arith.constant 0 : index
    %c0_22 = arith.constant 0 : index
    %c0_23 = arith.constant 0 : index
    %54 = vector.load %arg7[%c0_21, %c0_22, %c0_23] : memref<2x8x32xf32, #tpu.memory_space<vmem>>, vector<2x8x32xf32>
    tpu.vector_store %arg7[%c0_21, %c0_22, %c0_23], %53 {strides = array<i32>} : memref<2x8x32xf32, #tpu.memory_space<vmem>>, vector<2x8x32xf32>,
    return
  }
  func.func @transform_0(%arg0: i32) -> (i32, i32, i32) {
    %c0_i32 = arith.constant 0 : i32
    %c0_i32_0 = arith.constant 0 : i32
    %c0_i32_1 = arith.constant 0 : i32
    return %arg0, %c0_i32, %c0_i32_0 : i32, i32, i32
  }
  func.func @transform_1(%arg0: i32) -> (i32, i32) {
    %c0_i32 = arith.constant 0 : i32
    %c0_i32_0 = arith.constant 0 : i32
    %c0_i32_1 = arith.constant 0 : i32
    return %c0_i32, %c0_i32_0 : i32, i32
  }
  func.func @transform_2(%arg0: i32) -> (i32, i32) {
    %c0_i32 = arith.constant 0 : i32
    %c0_i32_0 = arith.constant 0 : i32
    %c0_i32_1 = arith.constant 0 : i32
    return %c0_i32, %c0_i32_0 : i32, i32
  }
  func.func @transform_3(%arg0: i32) -> (i32, i32) {
    %c0_i32 = arith.constant 0 : i32
    %c0_i32_0 = arith.constant 0 : i32
    %c0_i32_1 = arith.constant 0 : i32
    return %c0_i32, %c0_i32_0 : i32, i32
  }
  func.func @transform_4(%arg0: i32) -> (i32, i32) {
    %c0_i32 = arith.constant 0 : i32
    %c0_i32_0 = arith.constant 0 : i32
    %c0_i32_1 = arith.constant 0 : i32
    return %c0_i32, %c0_i32_0 : i32, i32
  }
  func.func @transform_5(%arg0: i32) -> (i32, i32) {
    %c0_i32 = arith.constant 0 : i32
    %c0_i32_0 = arith.constant 0 : i32
    %c0_i32_1 = arith.constant 0 : i32
    return %c0_i32, %c0_i32_0 : i32, i32
  }
  func.func @transform_6(%arg0: i32) -> (i32, i32, i32) {
    %c0_i32 = arith.constant 0 : i32
    %c0_i32_0 = arith.constant 0 : i32
    %c0_i32_1 = arith.constant 0 : i32
    return %arg0, %c0_i32, %c0_i32_0 : i32, i32, i32
  }
}

</mosaic_0001>

<bundles_post_ra>
// kernel: tpu_custom_call.1
= control target key start
LH: loop header
LB: loop body
LE: loop exit
PB: predicated region body
PF: predicated region fallthrough
CT: control target
= control target key end

     0   :  { %11 = vsyncpa [#allocation3], 0  ;;  %s1008_s0 = inlined_call_operand.hbm [shape: f32[4,8,32], index: 0, kind: input, shape index: {}]   ;;  %s1009_s1 = inlined_call_operand.hbm [shape: bf16[32,32], index: 1, kind: input, shape index: {}]   ;;  %s1010_s2 = inlined_call_operand.vmem [shape: f32[1,32], index: 2, kind: input, shape index: {}]   ;;  %s1011_s3 = inlined_call_operand.vmem [shape: f32[1,32], index: 3, kind: input, shape index: {}]   ;;  %s1012_s4 = inlined_call_operand.vmem [shape: f32[1,32], index: 4, kind: input, shape index: {}]   ;;  %s1013_s5 = inlined_call_operand.vmem [shape: f32[1,32], index: 5, kind: input, shape index: {}]   ;;  %s1014_s6 = inlined_call_operand.hbm [shape: f32[4,8,32], index: 6, kind: output, shape index: {}]  }
   0x1   :  { %13 = vsyncpa [#allocation3 + $0x1], 0 }
   0x2   :  { %14 = vsyncpa [#allocation6], 0 }
   0x3   :  { %15 = vsyncpa [#allocation4], 0 }
   0x4   :  { %17 = vsyncpa [#allocation4 + $0x1], 0  ;;  %s839_s21 = smov 0   ;;  %s841_s22 = smov 0  }
   0x5   :  { %s843_s23 = smov 0   ;;  %s845_s24 = smov 0  }
   0x6 LB: > { %s860_s25 = sadd.s32 4294967295, %s794_s24   ;;  %s549_s26 = sadd.s32 4294967294, %s794_s24   ;;  %s794_s24 = sphi %s845_s24, %s1024_s24   ;;  %s790_s23 = sphi %s843_s23, %s1023_s23   ;;  %s786_s22 = sphi %s841_s22, %s1022_s22   ;;  %s782_s21 = sphi %s839_s21, %s1021_s21  }
   0x7   : > { %p43_p0 = scmp.ne.s32.totalorder %s786_s22, %s782_s21  ;;  %p44_p1 = scmp.eq.s32.totalorder %s860_s25, 0 }
   0x8   : > { %p172_p2 = scmp.eq.s32.totalorder %s860_s25, 1  ;;  %p178_p3 = scmp.eq.s32.totalorder %s549_s26, 1 }
   0x9   : > { %p869_p4 = por %p44_p1, %p43_p0  ;;  %p550_p5 = scmp.ge.s32.totalorder %s794_s24, 1 }
   0xa   : > { %p874_p6 = por %p178_p3, %p43_p0  ;;  %p185_p7 = scmp.lt.s32.totalorder %s794_s24, 3 }
   0xb   : > { %s196_s7 = sshll.u32 %s1009_s1, 4  ;;  %s796_s9 = smov [#allocation5]   ;;  %s197_s7 = int_to_ptr.hbm [resolvable:$true] %s196_s7 }
   0xc   : > { %p882_p8 = pnand %p550_p5, %p185_p7  ;;  %s198_s10 = sshll.u32 %s796_s9, 4  ;;  %s199_s10 = int_to_ptr.vmem [resolvable:$true] %s198_s10 }
   0xd   : > { %s892_s11 = sadd.s32 1, %s794_s24   ;;  %s797_s12 = smov 64  }
   0xe   : > { %p586_p9 = pneg %p882_p8  ;;  %s798_s13 = smov 4  }
   0xf   : > { %s27_s14 = ssub.s32 %s794_s24, %s892_s11  ;;  %s30_s15 = sadd.s32 1, %s790_s23 }
  0x10   : > { %p587_p10 = pnand %p586_p9, %p44_p1  ;;  %p28_p12 = scmp.eq.s32.totalorder %s27_s14, 0 }
  0x11   : > { %p37_p13 = scmp.ne.s32.totalorder %s790_s23, %s786_s22  ;;  %p38_p0 = scmp.eq.s32.totalorder %s794_s24, 0 }
  0x12   : > { %589 = dma.hbm_to_vmem [thread:$0]  (!%p587_p10), %s197_s7, 256, %s199_s10, [#allocation6], %s797_s12, %s797_s12, %s798_s13  }
  0x13   : > { %p599_p3 = scmp.lt.s32.totalorder %s794_s24, 2  ;;  %p39_p5 = por %p38_p0, %p37_p13 }
  0x14   : > { %s902_s16 = scalar_select %p28_p12, %s790_s23, %s30_s15  }
  0x15   : > { %p906_p7 = por %p172_p2, %p37_p13  ;;  %s224_s18 = sand.u32 1, %s790_s23  }
  0x16   : > { %s574_s19 = sshll.u32 %s794_s24, 4  ;;  %s553_s20 = sshll.u32 %s224_s18, 4 }
  0x17   : > { %s233_s30 = scalar_lea.hbm %s1008_s0, %s574_s19  ;;  %s228_s9 = scalar_lea.vmem [#allocation2], %s553_s20 }
  0x18   : > { %s234_s7 = sshll.u32 %s233_s30, 4  ;;  %s236_s10 = sshll.u32 %s228_s9, 4  ;;  %s235_s7 = int_to_ptr.hbm [resolvable:$true] %s234_s7  ;;  %s237_s10 = int_to_ptr.vmem [resolvable:$true] %s236_s10 }
  0x19   : > { %p917_p9 = pnand %p599_p3, %p39_p5  ;;  %s225_s13 = scalar_lea.sflag [#allocation3], %s224_s18 }
  0x1a   : > { %s694_s14 = sshra.s32 %s235_s7, 4  ;;  %s701_s26 = scalar_lea.hbm %s1008_s0, 32  ;;  %s695_s14 = int_to_ptr.hbm [resolvable:$true] %s694_s14 }
  0x1b   : > { %s696_s15 = scalar_lea.hbm %s695_s14, 16  ;;  %p698_p10 = pneg %p917_p9 }
  0x1c   : > { %p697_p2 = scmp.ne.s32.totalorder %s695_s14, %s696_s15  ;;  %p702_p0 = scmp.lt.s32.totalorder %s695_s14, %s1008_s0 }
  0x1d   : > { %p703_p3 = scmp.lt.s32.totalorder %s701_s26, %s696_s15 }
  0x1e   : > { %p699_p12 = pnand %p698_p10, %p697_p2 }
  0x1f   : > { %p704_p5 = por %p703_p3, %p702_p0 }
  0x20   : > { %p700_p13 = pneg %p699_p12 }
  0x22   : > { %p705_p11 = pnand %p704_p5, %p700_p13 }
  0x24   : > { %708 = shalt.err (!%p705_p11)
}
  0x25   : > { %s799_s18 = smov 128   ;;  %s800_s9 = smov 8  }
  0x26   : > { %593 = dma.hbm_to_vmem [thread:$0]  (!%p917_p9), %s235_s7, 256, %s237_s10, %s225_s13, %s799_s18, %s799_s18, %s800_s9  }
  0x27   : > { %248 = sbr.rel (%p882_p8) target bundleno = 637 (0x27d), region = 44  ;;  %s934_s19 = sand.u32 (!%p882_p8), 1, %s786_s22  }
  0x28   : > { %s557_s14 = sshll.u32 (!%p882_p8), %s934_s19, 4  ;;  %s251_s15 = scalar_lea.sflag (!%p882_p8), [#allocation3], %s934_s19 }
  0x29   : > { %s254_s20 = scalar_lea.vmem (!%p882_p8), [#allocation2], %s557_s14 }
  0x2c   : > { %769 = dma.done.wait (%p869_p4), %s251_s15, 256  }
  0x2d   : > { %771 = vsyncadd (%p869_p4), %s251_s15, 4294967040 }
  0x2e   : > { %773 = dma.done.wait (%p44_p1), [#allocation6], 256  }
  0x2f   : > { %775 = vsyncadd (%p44_p1), [#allocation6], 4294967040  ;;  %v576_v0 = vld [vmem:[#allocation5 + $0x8] sm:$0xff]  ;;  %v575_v1 = vld [vmem:[#allocation5] sm:$0xff]  ;;  %vm315_vm0 = vcmask 261120   ;;  %v801_v59 = vmov 32.0  }
  0x30   : > { %v292_v2 = vld [vmem:[%s254_s20] sm:$0xff]  ;;  %v948_v3 = vld [vmem:[%s254_s20 + $0x8] sm:$0xff]  ;;  %325 = vmatpush.bf16.msra.mxu0 %v576_v0  ;;  %s577_s30 = sshll.u32 %s860_s25, 4  ;;  %s288_s20 = scalar_lea.vmem [#allocation7], %s557_s14 }
  0x31   : > { %v294_v4 = vpack.c.bf16 %v948_v3, %v292_v2  ;;  %v642_v5 = vld [vmem:[%s1010_s2] ss:$0 sm:$0xff]  ;;  %s462_s15 = scalar_lea.hbm %s1014_s6, %s577_s30  ;;  %s463_s27 = sshll.u32 %s288_s20, 4  ;;  %s464_s27 = int_to_ptr.vmem [resolvable:$true] %s463_s27 }
  0x32   : > { %v643_v8 = vld [vmem:[%s1011_s3] ss:$0 sm:$0xff]  ;;  %s465_s25 = sshll.u32 %s462_s15, 4  ;;  %s451_s8 = scalar_lea.sflag [#allocation4], %s934_s19  ;;  %s466_s25 = int_to_ptr.hbm [resolvable:$true] %s465_s25 }
  0x33   : > { %s738_s7 = sshra.s32 %s466_s25, 4  ;;  %s744_s13 = scalar_lea.hbm %s1014_s6, 32  ;;  %s739_s7 = int_to_ptr.hbm [resolvable:$true] %s738_s7 }
  0x34   : > { %326 = vmatpush.bf16.msra.mxu0 %v575_v1  ;;  %s740_s10 = scalar_lea.hbm %s739_s7, 16  ;;  %p745_p11 = scmp.lt.s32.totalorder %s739_s7, %s1014_s6 }
  0x35   : > { %p741_p1 = scmp.ne.s32.totalorder %s739_s7, %s740_s10  ;;  %p746_p9 = scmp.lt.s32.totalorder %s744_s13, %s740_s10 }
  0x37   : > { %568 = vmatmul.msk.bf16.vlgmr.msra.gmra.mxu0 %vm315_vm0, %v294_v4  ;;  %p742_p4 = pnand %p741_p1, %p906_p7  ;;  %p747_p2 = por %p746_p9, %p745_p11 }
  0x39   : > { %p743_p8 = pneg %p742_p4 }
  0x3b   : > { %p748_p10 = pnand %p747_p2, %p743_p8 }
  0xb4   : > { %v328_v6 = vpop.f32.mrf.mxu0 }
  0xb5   : > { %v329_v7 = vadd.f32 %v642_v5, %v328_v6 }
  0xb7   : > { %646 = vtanh.f32 %v329_v7 }
  0xbc   : > { %v330_v9 = vpop.f32.mrf.mxu0 }
  0xbd   : > { %v647_v10 = vpop.eup %646  ;;  %v331_v11 = vadd.f32 %v642_v5, %v330_v9 }
  0xbe   : > { %v339_v12 = vmul.f32 %v647_v10, %v643_v8 }
  0xbf   : > { %648 = vtanh.f32 %v331_v11 }
  0xc0   : > { %v341_v13 = vsel %vm315_vm0, %v339_v12, 0.0 }
  0xc1   : > { %342 = vadd.xlane.f32.xlu0 %v341_v13 }
  0xc5   : > { %v649_v14 = vpop.eup %648 }
  0xc6   : > { %v340_v15 = vmul.f32 %v649_v14, %v643_v8 }
  0xc8   : > { %v344_v16 = vsel %vm315_vm0, %v340_v15, 0.0 }
  0xc9   : > { %345 = vadd.xlane.f32.xlu0 %v344_v16 }
 0x134   : > { %v343_v17 = vpop.xlane.xlu0 %342 }
 0x135   : > { %v347_v18 = vrot.slane %v343_v17, 4 }
 0x137   : > { %v348_v19 = vmax.f32 %v343_v17, %v347_v18 }
 0x139   : > { %v349_v20 = vrot.slane %v348_v19, 2 }
 0x13b   : > { %v350_v21 = vmax.f32 %v348_v19, %v349_v20 }
 0x13c   : > { %v346_v22 = vpop.xlane.xlu0 %345 }
 0x13d   : > { %v351_v23 = vrot.slane %v350_v21, 1  ;;  %v353_v24 = vrot.slane %v346_v22, 4 }
 0x13f   : > { %v352_v25 = vmax.f32 %v350_v21, %v351_v23  ;;  %v354_v26 = vmax.f32 %v346_v22, %v353_v24 }
 0x141   : > { %v359_v27 = vsub.f32 %v343_v17, %v352_v25  ;;  %v355_v28 = vrot.slane %v354_v26, 2 }
 0x143   : > { %v361_v29 = vmul.f32 1.442695, %v359_v27  ;;  %v356_v30 = vmax.f32 %v354_v26, %v355_v28  ;;  %v644_v26 = vld [vmem:[%s1012_s4] ss:$0 sm:$0xff] }
 0x145   : > { %650 = vpow2.f32 %v361_v29  ;;  %v357_v31 = vrot.slane %v356_v30, 1  ;;  %v645_v29 = vld [vmem:[%s1013_s5] ss:$0 sm:$0xff] }
 0x147   : > { %v358_v32 = vmax.f32 %v356_v30, %v357_v31 }
 0x149   : > { %v360_v33 = vsub.f32 %v346_v22, %v358_v32 }
 0x14b   : > { %v651_v34 = vpop.eup %650  ;;  %v363_v35 = vmul.f32 1.442695, %v360_v33 }
 0x14c   : > { %v365_v36 = vrot.slane %v651_v34, 4 }
 0x14d   : > { %652 = vpow2.f32 %v363_v35 }
 0x14e   : > { %v366_v37 = vadd.f32 %v651_v34, %v365_v36 }
 0x150   : > { %v367_v38 = vrot.slane %v366_v37, 2 }
 0x152   : > { %v368_v39 = vadd.f32 %v367_v38, %v366_v37 }
 0x153   : > { %v653_v40 = vpop.eup %652 }
 0x154   : > { %v369_v41 = vrot.slane %v368_v39, 1  ;;  %v371_v42 = vrot.slane %v653_v40, 4 }
 0x156   : > { %v370_v43 = vadd.f32 %v369_v41, %v368_v39  ;;  %v372_v44 = vadd.f32 %v653_v40, %v371_v42 }
 0x158   : > { %654 = vrcp.f32 %v370_v43  ;;  %v373_v45 = vrot.slane %v372_v44, 2 }
 0x15a   : > { %v374_v46 = vadd.f32 %v373_v45, %v372_v44 }
 0x15c   : > { %v375_v47 = vrot.slane %v374_v46, 1 }
 0x15e   : > { %v655_v48 = vpop.eup %654  ;;  %v376_v49 = vadd.f32 %v375_v47, %v374_v46 }
 0x15f   : > { %v379_v50 = vmul.f32 %v655_v48, %v651_v34 }
 0x160   : > { %656 = vrcp.f32 %v376_v49 }
 0x161   : > { %v381_v51 = vadd.f32 1.0, %v379_v50  ;;  %658 = vrcp.f32 %v801_v59 }
 0x163   : > { %v383_v52 = vmul.f32 %v381_v51, %v292_v2 }
 0x165   : > { %v385_v53 = vsel %vm315_vm0, %v383_v52, 0.0 }
 0x166   : > { %v657_v54 = vpop.eup %656  ;;  %386 = vadd.xlane.f32.xlu1 %v385_v53 }
 0x167   : > { %v380_v55 = vmul.f32 %v657_v54, %v653_v40  ;;  %v659_v60 = vpop.eup %658 }
 0x168   : > { %v392_v61 = vmul.f32 32.0, %v659_v60  ;;  %vm396_vm1 = vweird.f32 %v659_v60 }
 0x169   : > { %v382_v56 = vadd.f32 1.0, %v380_v55 }
 0x16a   : > { %v393_v62 = vsub.f32 1.0, %v392_v61 }
 0x16b   : > { %v384_v57 = vmul.f32 %v382_v56, %v948_v3 }
 0x16c   : > { %v394_v63 = vmul.f32 %v659_v60, %v393_v62 }
 0x16d   : > { %v388_v58 = vsel %vm315_vm0, %v384_v57, 0.0 }
 0x16e   : > { %389 = vadd.xlane.f32.xlu1 %v388_v58  ;;  %v395_v0 = vadd.f32 %v659_v60, %v394_v63 }
 0x170   : > { %v397_v1 = vsel %vm396_vm1, %v659_v60, %v395_v0 }
 0x1d9   : > { %v387_v2 = vpop.xlane.xlu1 %386 }
 0x1da   : > { %v398_v4 = vmul.f32 %v397_v1, %v387_v2 }
 0x1dc   : > { %v400_v5 = vsub.f32 %v383_v52, %v398_v4 }
 0x1de   : > { %v402_v6 = vmul.f32 %v400_v5, %v400_v5 }
 0x1e0   : > { %v404_v7 = vsel %vm315_vm0, %v402_v6, 0.0 }
 0x1e1   : > { %405 = vadd.xlane.f32.xlu2 %v404_v7  ;;  %v390_v3 = vpop.xlane.xlu1 %389 }
 0x1e2   : > { %v399_v8 = vmul.f32 %v397_v1, %v390_v3 }
 0x1e4   : > { %v401_v9 = vsub.f32 %v384_v57, %v399_v8 }
 0x1e6   : > { %v403_v10 = vmul.f32 %v401_v9, %v401_v9 }
 0x1e8   : > { %v407_v11 = vsel %vm315_vm0, %v403_v10, 0.0 }
 0x1e9   : > { %408 = vadd.xlane.f32.xlu2 %v407_v11 }
 0x254   : > { %v406_v12 = vpop.xlane.xlu2 %405 }
 0x255   : > { %v410_v13 = vmul.f32 %v406_v12, %v397_v1 }
 0x257   : > { %v412_v14 = vadd.f32 1e-05, %v410_v13 }
 0x259   : > { %660 = vrsqrt.f32 %v412_v14  ;;  %vm420_vm3 = vweird.f32 %v412_v14 }
 0x25c   : > { %v409_v15 = vpop.xlane.xlu2 %408 }
 0x25d   : > { %v411_v16 = vmul.f32 %v409_v15, %v397_v1 }
 0x25f   : > { %v661_v17 = vpop.eup %660  ;;  %v413_v18 = vadd.f32 1e-05, %v411_v16 }
 0x260   : > { %v415_v19 = vmul.f32 %v661_v17, %v412_v14  ;;  %vm421_vm2 = vweird.f32 %v661_v17 }
 0x261   : > { %662 = vrsqrt.f32 %v413_v18  ;;  %vm422_vm4 = vmor %vm420_vm3, %vm421_vm2  ;;  %vm430_vm6 = vweird.f32 %v413_v18 }
 0x262   : > { %v416_v20 = vmul.f32 %v661_v17, %v415_v19 }
 0x264   : > { %v417_v21 = vmul.f32 0.5, %v416_v20 }
 0x266   : > { %v418_v22 = vsub.f32 1.5, %v417_v21 }
 0x267   : > { %v663_v23 = vpop.eup %662 }
 0x268   : > { %v419_v24 = vmul.f32 %v661_v17, %v418_v22  ;;  %v425_v25 = vmul.f32 %v663_v23, %v413_v18  ;;  %vm431_vm5 = vweird.f32 %v663_v23 }
 0x269   : > { %vm432_vm7 = vmor %vm430_vm6, %vm431_vm5 }
 0x26a   : > { %v423_v27 = vsel %vm422_vm4, %v661_v17, %v419_v24  ;;  %v426_v28 = vmul.f32 %v663_v23, %v425_v25 }
 0x26b   : > { %v434_v30 = vmul.f32 %v423_v27, %v400_v5 }
 0x26c   : > { %v427_v31 = vmul.f32 0.5, %v426_v28 }
 0x26d   : > { %v440_v32 = vmul.f32 %v644_v26, %v434_v30 }
 0x26e   : > { %v428_v33 = vsub.f32 1.5, %v427_v31 }
 0x26f   : > { %v446_v34 = vadd.f32 %v645_v29, %v440_v32 }
 0x270   : > { %v429_v35 = vmul.f32 %v663_v23, %v428_v33 }
 0x271   : > { %448 = vst.msk [vmem:[%s288_s20] sm:$0xff] %vm315_vm0, %v446_v34 }
 0x272   : > { %v433_v36 = vsel %vm432_vm7, %v663_v23, %v429_v35 }
 0x273   : > { %v435_v37 = vmul.f32 %v433_v36, %v401_v9 }
 0x275   : > { %v441_v38 = vmul.f32 %v644_v26, %v435_v37 }
 0x277   : > { %v447_v39 = vadd.f32 %v645_v29, %v441_v38 }
 0x279   : > { %449 = vst.msk [vmem:[%s288_s20 + $0x8] sm:$0xff] %vm315_vm0, %v447_v39 }
 0x27a   : > { %751 = shalt.err (!%p748_p10)
}
 0x27b   : > { %s802_s19 = smov 128   ;;  %s803_s30 = smov 8  }
 0x27c   : > { %584 = dma.vmem_to_hbm [thread:$0]  (%p906_p7), %s464_s27, 256, %s466_s25, %s451_s8, %s802_s19, %s802_s19, %s803_s30  }
 0x27d PF: > { %s480_s18 = sand.u32 1, %s782_s21   ;;  %p1020_p12 = scmp.ge.s32.totalorder %s794_s24, 2 }
 0x27e   : > { %s481_s9 = scalar_lea.sflag [#allocation4], %s480_s18 }
 0x27f   : > { %p595_p13 = pnand %p1020_p12, %p874_p6 }
 0x281   : > { %p596_p0 = pneg %p595_p13 }
 0x283   : > { %777 = dma.done.wait (%p596_p0), %s481_s9, 256  }
 0x284   : > { %779 = vsyncadd (%p596_p0), %s481_s9, 4294967040  ;;  %p20_p3 = scmp.ge.s32.totalorder %s892_s11, 4   ;;  %s1021_s21 = smov %s786_s22 }
 0x285   : > { %s1022_s22 = smov %s790_s23  ;;  %s1023_s23 = smov %s902_s16 }
 0x286   : > { %s1024_s24 = smov %s892_s11  ;;  %22 = sbr.rel (!%p20_p3) target bundleno = 6 (0x6), region = 93 }
 0x28b   :  { %487 = vsyncpa [#allocation3], 1 }
 0x28c   :  { %489 = vsyncpa [#allocation3 + $0x1], 1 }
 0x28d   :  { %490 = vsyncpa [#allocation6], 1 }
 0x28e   :  { %491 = vsyncpa [#allocation4], 1 }
 0x28f   :  { %493 = vsyncpa [#allocation4 + $0x1], 1 }

</bundles_post_ra>
